<compile_context>
chip_gen: v6e
topology: v6e:2x2x1
jax: 0.10.0
libtpu: 0.0.40
codegen_flags: <defaults>
</compile_context>

<pallas_src>
import functools

import jax
import jax.numpy as jnp
from jax import lax
from jax.experimental import pallas as pl
from jax.experimental.pallas import tpu as pltpu


def _seq_nll_kernel(x_ref, t_ref, out_ref, acc_ref, *,
                    pack, last_block, rows_in_last, guard_overflow):
    # x_ref  : (TR, L)    log-prob tile (input dtype; cast to f32 in-kernel)
    # t_ref  : (TR, pack) int8/int32 encoded targets (absolute lane index, -1 = masked)
    # out_ref: (1, 1, L)  f32 per-chunk partial sums (lane-resident)
    # acc_ref: (1, L)     f32 running partial (tiny: no full-tile accumulator RMW)
    c = pl.program_id(0)                 # parallel row-chunk axis
    i = pl.program_id(1)                 # serial reduction axis within the chunk
    spc = pl.num_programs(1)
    step = c * spc + i                   # global (un-clamped) block step

    @pl.when(i == 0)
    def _():
        acc_ref[...] = jnp.zeros_like(acc_ref)

    def accumulate(limit_rows):
        x = x_ref[...].astype(jnp.float32)     # per-tile upcast (v5e VPU has no bf16)
        t = t_ref[...].astype(jnp.int32)       # (TR, pack): tiny
        TR, L = x.shape
        col = lax.broadcasted_iota(jnp.int32, (TR, L), 1)
        hit = col == t[:, 0:1]
        for k in range(1, pack):               # small static unroll (pack = 128//C)
            hit = jnp.logical_or(hit, col == t[:, k:k + 1])
        if limit_rows is not None:             # final partial block only
            row = lax.broadcasted_iota(jnp.int32, (TR, 1), 0)
            hit = jnp.logical_and(hit, row < limit_rows)
        # Select (not multiply): padding of the final partial block may hold
        # stale NaN/garbage VMEM.  Sublane reduce keeps the accumulator one vreg.
        acc_ref[...] += jnp.sum(jnp.where(hit, x, 0.0), axis=0, keepdims=True)

    full_tile_last = rows_in_last == x_ref.shape[0]     # static Python bool

    if full_tile_last and not guard_overflow:
        accumulate(None)                       # common fast path: no masks at all
    elif full_tile_last:
        @pl.when(step <= last_block)           # skip clamped overflow steps
        def _():
            accumulate(None)
    else:
        @pl.when(step < last_block)            # steady state: no row mask
        def _():
            accumulate(None)

        @pl.when(step == last_block)           # partial block: mask invalid rows
        def _():
            accumulate(rows_in_last)

    @pl.when(i == spc - 1)
    def _():
        out_ref[...] = acc_ref[...].reshape(1, 1, acc_ref.shape[-1])


def _device_kind():
    try:
        return jax.devices()[0].device_kind.lower()
    except Exception:
        return ""


def _default_num_chunks():
    # v7x has 2 TensorCores per chip; shard the parallel row-chunk axis across them.
    return 2 if "v7" in _device_kind() else 1


def _vmem_budget_bytes():
    kind = _device_kind()
    if "v5 lite" in kind or "v5e" in kind or "v5litepod" in kind:
        return 12 * 1024 * 1024      # v5e: slowest HBM, smallest default scoped VMEM
    return 22 * 1024 * 1024          # v6e / v7x (per-TC VMEM); raised via vmem_limit


def sequence_criterion(inputs, targets, *, tile_rows=None, num_chunks=None):
    """inputs: (..., C) log-probabilities; targets: (...) integer class ids.
    Returns scalar f32 loss = NLLLoss(weight[0]=0, reduction='sum')."""
    C = inputs.shape[-1]
    N = int(targets.size)
    x = inputs.reshape(N, C)                       # reshape only; no dtype copy in HBM
    t = targets.reshape(N).astype(jnp.int32)

    # PyTorch NLLLoss raises on targets outside [0, C); we contribute 0 instead.
    # TODO(synk): no clean in-kernel error path on TPU for invalid class ids.
    keep = jnp.logical_and(t > 0, t < C)

    # Lane-dense packing: 128//C consecutive rows share one 128-lane slab.
    if C < 128 and 128 % C == 0:
        pack = 128 // C
        pad = (-N) % pack
        if pad:
            # One-time HBM copy; keeps every vreg/DMA fully lane-dense afterwards.
            x = jnp.concatenate([x, jnp.zeros((pad, C), x.dtype)], axis=0)
            keep = jnp.concatenate([keep, jnp.zeros((pad,), jnp.bool_)], axis=0)
            t = jnp.concatenate([t, jnp.zeros((pad,), jnp.int32)], axis=0)
        Np = N + pad
        L = 128
        R = Np // pack
        x_k = x.reshape(R, L)                      # free, contiguous reshape
        lane = t + C * (jnp.arange(Np, dtype=jnp.int32) % pack)
        t_enc = jnp.where(keep, lane, -1).reshape(R, pack)
        max_code = 127
    else:
        pack = 1
        L = C
        R = N
        x_k = x
        t_enc = jnp.where(keep, t, -1).reshape(R, 1)
        max_code = C - 1

    if num_chunks is None:
        num_chunks = _default_num_chunks()

    itemsize = jnp.dtype(x_k.dtype).itemsize
    # Per-row VMEM: double-buffered x + double-buffered lane-padded targets + slack
    # for Mosaic's full-tile temporaries (iota / masks / select) in the traced body.
    bytes_per_row = L * (2 * itemsize + 5 * 4) + 2 * 128
    if tile_rows is None:
        budget = _vmem_budget_bytes()
        tile_rows = max(32, min(8192, (budget // bytes_per_row) // 32 * 32))
    if tile_rows >= R:
        tile_rows = R                              # full-dim block is always legal

    # int8 target codes (fit in [-1, 127]) quarter the lane-padded VMEM footprint of
    # the target stream; only when the row tile keeps int8 sublane tiling aligned.
    if max_code <= 127 and tile_rows % 32 == 0:
        t_enc = t_enc.astype(jnp.int8)

    total_steps = pl.cdiv(R, tile_rows)
    num_chunks = max(1, min(num_chunks, total_steps))
    spc = pl.cdiv(total_steps, num_chunks)
    num_chunks = pl.cdiv(total_steps, spc)         # drop chunks that would be empty
    last_block = total_steps - 1
    rows_in_last = R - last_block * tile_rows
    guard_overflow = num_chunks * spc != total_steps

    def in_map(c, i):
        return (jnp.minimum(c * spc + i, last_block), 0)

    kernel = functools.partial(
        _seq_nll_kernel, pack=pack, last_block=last_block,
        rows_in_last=rows_in_last, guard_overflow=guard_overflow)

    est_vmem = tile_rows * (L * (2 * itemsize + 5 * 4)
                            + 2 * 128 * jnp.dtype(t_enc.dtype).itemsize)
    vmem_limit = int(min(48 << 20, max(32 << 20, est_vmem + (8 << 20))))

    partials = pl.pallas_call(
        kernel,
        out_shape=jax.ShapeDtypeStruct((num_chunks, 1, L), jnp.float32),
        grid_spec=pltpu.PrefetchScalarGridSpec(
            num_scalar_prefetch=0,
            grid=(num_chunks, spc),
            in_specs=[
                pl.BlockSpec((tile_rows, L), in_map),
                pl.BlockSpec((tile_rows, pack), in_map),
            ],
            out_specs=pl.BlockSpec((1, 1, L), lambda c, i: (c, 0, 0)),
            scratch_shapes=[pltpu.VMEM((1, L), jnp.float32)],
        ),
        compiler_params=pltpu.CompilerParams(
            dimension_semantics=("parallel", "arbitrary"),
            vmem_limit_bytes=vmem_limit,
        ),
    )(x_k, t_enc)

    # Tiny cross-lane / cross-chunk reduction + sign flip done by XLA.
    return -jnp.sum(partials)


def _ref_loss(log_probs, targets):
    C = log_probs.shape[-1]
    xr = log_probs.astype(jnp.float32).reshape(-1, C)
    tr = targets.reshape(-1)
    picked = jnp.take_along_axis(xr, tr[:, None], axis=1)[:, 0]
    return -jnp.sum(jnp.where(tr != 0, picked, 0.0))


if __name__ == "__main__":
    key = jax.random.PRNGKey(0)
    k1, k2, k3, k4, k5, k6, k7, k8 = jax.random.split(key, 8)

    # 1) Module-scale example: batch=2, seq=8, nc=32 (matches SequenceCriterion(32)).
    B, T, C = 2, 8, 32
    lp = jax.nn.log_softmax(jax.random.normal(k1, (B, T, C), jnp.float32), axis=-1)
    tg = jax.random.randint(k2, (B, T), 0, C, dtype=jnp.int32)   # class 0 = padding
    loss = jax.block_until_ready(sequence_criterion(lp, tg))
    ref = _ref_loss(lp, tg)
    assert jnp.allclose(loss, ref, rtol=1e-5, atol=1e-5), (loss, ref)

    # 2) Multi-block + 2 chunks + clamped overflow step + partial last block + int8
    #    target codes (N=320 -> R=80 packed rows; tile_rows=32 -> 3 blocks).
    B2, T2, C2 = 2, 160, 32
    lp2 = jax.nn.log_softmax(jax.random.normal(k3, (B2, T2, C2), jnp.float32), axis=-1)
    tg2 = jax.random.randint(k4, (B2, T2), 0, C2, dtype=jnp.int32)
    loss2 = jax.block_until_ready(
        sequence_criterion(lp2, tg2, tile_rows=32, num_chunks=2))
    assert jnp.allclose(loss2, _ref_loss(lp2, tg2), rtol=1e-5, atol=1e-5)

    # 3) Non-packed fallback path (C does not divide 128).
    C3 = 40
    lp3 = jax.nn.log_softmax(jax.random.normal(k5, (B, T, C3), jnp.float32), axis=-1)
    tg3 = jax.random.randint(k6, (B, T), 0, C3, dtype=jnp.int32)
    loss3 = jax.block_until_ready(sequence_criterion(lp3, tg3))
    assert jnp.allclose(loss3, _ref_loss(lp3, tg3), rtol=1e-5, atol=1e-5)

    # 4) N not a multiple of 128//C (pad-to-pack path) + bf16 inputs (in-kernel cast).
    B4, T4, C4 = 1, 9, 32
    lp4 = jax.nn.log_softmax(jax.random.normal(k7, (B4, T4, C4), jnp.float32), axis=-1)
    lp4 = lp4.astype(jnp.bfloat16)
    tg4 = jax.random.randint(k8, (B4, T4), 0, C4, dtype=jnp.int32)
    loss4 = jax.block_until_ready(sequence_criterion(lp4, tg4))
    ref4 = _ref_loss(lp4, tg4)
    assert jnp.allclose(loss4, ref4, rtol=1e-3, atol=1e-3), (loss4, ref4)

    print("KERNEL_OK")
</pallas_src>

<mosaic_0001>
module attributes {stable_mosaic.version = 11 : i64} {
  func.func @_seq_nll_kernel(%arg0: i32, %arg1: i32, %arg2: memref<4x128xf32, #tpu.memory_space<vmem>>, %arg3: memref<4x4xi32, #tpu.memory_space<vmem>>, %arg4: memref<1x1x128xf32, #tpu.memory_space<vmem>>, %arg5: memref<1x128xf32, #tpu.memory_space<vmem>>) attributes {dimension_semantics = [#tpu.dimension_semantics<parallel>, #tpu.dimension_semantics<arbitrary>], iteration_bounds = array<i64: 1, 1>, scalar_prefetch = 0 : i64, scratch_operands = 1 : i64, tpu.core_type = #tpu.core_type<tc>, window_params = [{transform_indices = @transform_0, window_bounds = array<i64: 4, 128>}, {transform_indices = @transform_1, window_bounds = array<i64: 4, 4>}, {transform_indices = @transform_2, window_bounds = array<i64: 1, 1, 128>}]} {
    %c0_i32 = arith.constant 0 : i32
    %0 = arith.cmpi eq, %arg1, %c0_i32 : i32
    %1 = arith.extui %0 : i1 to i32
    %c0_i32_0 = arith.constant 0 : i32
    %2 = arith.cmpi ne, %1, %c0_i32_0 : i32
    scf.if %2 {
      %cst_11 = arith.constant 0.000000e+00 : f32
      %31 = vector.broadcast %cst_11 : f32 to vector<1x128xf32>
      %c0_12 = arith.constant 0 : index
      %c0_13 = arith.constant 0 : index
      %32 = vector.load %arg5[%c0_12, %c0_13] : memref<1x128xf32, #tpu.memory_space<vmem>>, vector<1x128xf32>
      tpu.vector_store %arg5[%c0_12, %c0_13], %31 {strides = array<i32>} : memref<1x128xf32, #tpu.memory_space<vmem>>, vector<1x128xf32>,
    } else {
    }
    %c0 = arith.constant 0 : index
    %c0_1 = arith.constant 0 : index
    %3 = vector.load %arg2[%c0, %c0_1] : memref<4x128xf32, #tpu.memory_space<vmem>>, vector<4x128xf32>
    %c0_2 = arith.constant 0 : index
    %c0_3 = arith.constant 0 : index
    %4 = vector.load %arg3[%c0_2, %c0_3] : memref<4x4xi32, #tpu.memory_space<vmem>>, vector<4x4xi32>
    %5 = tpu.iota {dimensions = array<i32: 1>} : vector<4x128xi32>
    %6 = vector.extract_strided_slice %4 {offsets = [0, 0], sizes = [4, 1], strides = [1, 1]} : vector<4x4xi32> to vector<4x1xi32>
    %7 = vector.broadcast %6 : vector<4x1xi32> to vector<4x128xi32>
    %8 = arith.cmpi eq, %5, %7 : vector<4x128xi32>
    %9 = vector.extract_strided_slice %4 {offsets = [0, 1], sizes = [4, 1], strides = [1, 1]} : vector<4x4xi32> to vector<4x1xi32>
    %10 = vector.broadcast %9 : vector<4x1xi32> to vector<4x128xi32>
    %11 = arith.cmpi eq, %5, %10 : vector<4x128xi32>
    %12 = arith.ori %8, %11 : vector<4x128xi1>
    %13 = vector.extract_strided_slice %4 {offsets = [0, 2], sizes = [4, 1], strides = [1, 1]} : vector<4x4xi32> to vector<4x1xi32>
    %14 = vector.broadcast %13 : vector<4x1xi32> to vector<4x128xi32>
    %15 = arith.cmpi eq, %5, %14 : vector<4x128xi32>
    %16 = arith.ori %12, %15 : vector<4x128xi1>
    %17 = vector.extract_strided_slice %4 {offsets = [0, 3], sizes = [4, 1], strides = [1, 1]} : vector<4x4xi32> to vector<4x1xi32>
    %18 = vector.broadcast %17 : vector<4x1xi32> to vector<4x128xi32>
    %19 = arith.cmpi eq, %5, %18 : vector<4x128xi32>
    %20 = arith.ori %16, %19 : vector<4x128xi1>
    %c0_4 = arith.constant 0 : index
    %c0_5 = arith.constant 0 : index
    %21 = vector.load %arg5[%c0_4, %c0_5] : memref<1x128xf32, #tpu.memory_space<vmem>>, vector<1x128xf32>
    %cst = arith.constant 0.000000e+00 : f32
    %22 = vector.broadcast %cst : f32 to vector<4x128xf32>
    %23 = arith.select %20, %3, %22 : vector<4x128xi1>, vector<4x128xf32>
    %cst_6 = arith.constant dense<0.000000e+00> : vector<128xf32>
    %24 = vector.multi_reduction <add>, %23, %cst_6 [0] : vector<4x128xf32> to vector<128xf32>
    %25 = vector.shape_cast %24 : vector<128xf32> to vector<1x128xf32>
    %26 = arith.addf %21, %25 : vector<1x128xf32>
    %c0_7 = arith.constant 0 : index
    %c0_8 = arith.constant 0 : index
    %27 = vector.load %arg5[%c0_7, %c0_8] : memref<1x128xf32, #tpu.memory_space<vmem>>, vector<1x128xf32>
    tpu.vector_store %arg5[%c0_7, %c0_8], %26 {strides = array<i32>} : memref<1x128xf32, #tpu.memory_space<vmem>>, vector<1x128xf32>,
    %c0_i32_9 = arith.constant 0 : i32
    %28 = arith.cmpi eq, %arg1, %c0_i32_9 : i32
    %29 = arith.extui %28 : i1 to i32
    %c0_i32_10 = arith.constant 0 : i32
    %30 = arith.cmpi ne, %29, %c0_i32_10 : i32
    scf.if %30 {
      %c0_11 = arith.constant 0 : index
      %c0_12 = arith.constant 0 : index
      %31 = vector.load %arg5[%c0_11, %c0_12] : memref<1x128xf32, #tpu.memory_space<vmem>>, vector<1x128xf32>
      %32 = vector.shape_cast %31 : vector<1x128xf32> to vector<1x1x128xf32>
      %c0_13 = arith.constant 0 : index
      %c0_14 = arith.constant 0 : index
      %c0_15 = arith.constant 0 : index
      %33 = vector.load %arg4[%c0_13, %c0_14, %c0_15] : memref<1x1x128xf32, #tpu.memory_space<vmem>>, vector<1x1x128xf32>
      tpu.vector_store %arg4[%c0_13, %c0_14, %c0_15], %32 {strides = array<i32>} : memref<1x1x128xf32, #tpu.memory_space<vmem>>, vector<1x1x128xf32>,
    } else {
    }
    return
  }
  func.func @transform_0(%arg0: i32, %arg1: i32) -> (i32, i32) {
    %c1_i32 = arith.constant 1 : i32
    %0 = arith.muli %arg0, %c1_i32 : i32
    %1 = arith.addi %0, %arg1 : i32
    %c0_i32 = arith.constant 0 : i32
    %2 = arith.minsi %1, %c0_i32 : i32
    %c0_i32_0 = arith.constant 0 : i32
    %c0_i32_1 = arith.constant 0 : i32
    return %2, %c0_i32_0 : i32, i32
  }
  func.func @transform_1(%arg0: i32, %arg1: i32) -> (i32, i32) {
    %c1_i32 = arith.constant 1 : i32
    %0 = arith.muli %arg0, %c1_i32 : i32
    %1 = arith.addi %0, %arg1 : i32
    %c0_i32 = arith.constant 0 : i32
    %2 = arith.minsi %1, %c0_i32 : i32
    %c0_i32_0 = arith.constant 0 : i32
    %c0_i32_1 = arith.constant 0 : i32
    return %2, %c0_i32_0 : i32, i32
  }
  func.func @transform_2(%arg0: i32, %arg1: i32) -> (i32, i32, i32) {
    %c0_i32 = arith.constant 0 : i32
    %c0_i32_0 = arith.constant 0 : i32
    %c0_i32_1 = arith.constant 0 : i32
    return %arg0, %c0_i32, %c0_i32_0 : i32, i32, i32
  }
}

</mosaic_0001>

<bundles_post_ra>
// kernel: tpu_custom_call.1
= control target key start
LH: loop header
LB: loop body
LE: loop exit
PB: predicated region body
PF: predicated region fallthrough
CT: control target
= control target key end

     0   :  { %7 = vsyncpa [#allocation4], 0  ;;  %s228_s0 = inlined_call_operand.hbm [shape: f32[4,128], index: 0, kind: input, shape index: {}]   ;;  %s229_s1 = inlined_call_operand.hbm [shape: s32[4,4], index: 1, kind: input, shape index: {}]   ;;  %s230_s2 = inlined_call_operand.hbm [shape: f32[1,1,128], index: 2, kind: output, shape index: {}]  }
   0x1   :  { %8 = vsyncpa [#allocation7], 0 }
   0x2   :  { %9 = vsyncpa [#allocation5], 0  ;;  %s196_s9 = smov [#allocation3]   ;;  %s197_s11 = smov [#allocation6]  }
   0x3   :  { %s21_s10 = sshll.u32 %s196_s9, 4  ;;  %s36_s12 = sshll.u32 %s197_s11, 4  ;;  %s22_s10 = int_to_ptr.vmem [resolvable:$true] %s21_s10  ;;  %s37_s12 = int_to_ptr.vmem [resolvable:$true] %s36_s12 }
   0x4   :  { %s138_s13 = scalar_lea.vmem %s22_s10, 64  ;;  %p143_p1 = scmp.lt.s32.totalorder %s22_s10, %s22_s10 }
   0x5   :  { %p139_p0 = scmp.ne.s32.totalorder %s22_s10, %s138_s13  ;;  %p144_p2 = scmp.lt.s32.totalorder %s138_s13, %s138_s13 }
   0x7   :  { %p145_p3 = por %p144_p2, %p143_p1 }
   0x9   :  { %p146_p4 = pnand %p145_p3, %p139_p0 }
   0xb   :  { %149 = shalt.err (!%p146_p4)
}
   0xc   :  { %24 = dma.hbm_to_vmem [thread:$0]  %s228_s0, 64, %s22_s10, [#allocation4]  }
   0xd   :  { %s158_s16 = scalar_lea.vmem %s37_s12, 64  ;;  %p163_p6 = scmp.lt.s32.totalorder %s37_s12, %s37_s12 }
   0xe   :  { %p159_p5 = scmp.ne.s32.totalorder %s37_s12, %s158_s16  ;;  %p164_p7 = scmp.lt.s32.totalorder %s158_s16, %s158_s16 }
  0x10   :  { %p165_p8 = por %p164_p7, %p163_p6 }
  0x12   :  { %p166_p9 = pnand %p165_p8, %p159_p5 }
  0x14   :  { %169 = shalt.err (!%p166_p9)
}
  0x15   :  { %39 = dma.hbm_to_vmem [thread:$0]  %s229_s1, 64, %s37_s12, [#allocation7]  }
  0x16   :  { %190 = dma.done.wait [#allocation4], 64  }
  0x17   :  { %191 = vsyncadd [#allocation4], 4294967232 }
  0x18   :  { %192 = dma.done.wait [#allocation7], 64  }
  0x19   :  { %193 = vsyncadd [#allocation7], 4294967232  ;;  %v198_v0 = vmov 0.0   ;;  %v199_v1 = vmov 0   ;;  %v200_v2 = vmov 2   ;;  %v201_v4 = vmov 1  }
  0x1a   :  { %56 = vst [vmem:[#allocation2] sm:$0x1] %v198_v0  ;;  %125 = vset.pattern.permute.xlu0 %v199_v1  ;;  %127 = vset.pattern.permute.xlu1 %v200_v2  ;;  %v58_v3 = vld [vmem:[#allocation6] sm:$0xf]  ;;  %v202_v5 = vmov 3   ;;  %v59_v6 = vlaneseq  ;;  %vm82_vm5 = vcmask 1043456  }
  0x1b   :  { %62 = vperm.xlu0 %125, %v58_v3   ;;  %71 = vperm.xlu1 %127, %v58_v3   ;;  %v57_v12 = vld [vmem:[#allocation3] sm:$0xf]  ;;  %s203_s0 = smov [#allocation8]  }
  0x1c   :  { %v60_v9 = vand.u32 127, %v59_v6  ;;  %s103_s1 = sshll.u32 %s203_s0, 4  ;;  %s104_s1 = int_to_ptr.vmem [resolvable:$true] %s103_s1 }
  0x1d   :  { %s170_s19 = scalar_lea.vmem %s104_s1, 16  ;;  %s174_s20 = scalar_lea.vmem %s104_s1, 32 }
  0x1e   :  { %p171_p10 = scmp.ne.s32.totalorder %s104_s1, %s170_s19  ;;  %p175_p11 = scmp.lt.s32.totalorder %s104_s1, %s104_s1 }
  0x1f   :  { %126 = vset.pattern.permute.xlu0 %v201_v4  ;;  %128 = vset.pattern.permute.xlu1 %v202_v5  ;;  %p176_p12 = scmp.lt.s32.totalorder %s174_s20, %s170_s19 }
  0x20   :  { %66 = vperm.xlu0 %126, %v58_v3   ;;  %76 = vperm.xlu1 %128, %v58_v3  }
  0x21   :  { %v80_v20 = vld [vmem:[#allocation2] sm:$0x1]  ;;  %p177_p13 = por %p176_p12, %p175_p11 }
  0x23   :  { %p178_p0 = pnand %p177_p13, %p171_p10 }
  0x24   :  { %129 = vset.pattern.permute.xlu0 %v202_v5 }
  0x96   :  { %v63_v7 = vpop.permute.xlu0 %62  ;;  %v72_v8 = vpop.permute.xlu1 %71 }
  0x97   :  { %vm64_vm0 = vcmp.eq.s32.totalorder %v60_v9, %v63_v7  ;;  %vm73_vm3 = vcmp.eq.s32.totalorder %v60_v9, %v72_v8 }
  0x9b   :  { %v67_v10 = vpop.permute.xlu0 %66  ;;  %v77_v11 = vpop.permute.xlu1 %76 }
  0x9c   :  { %vm68_vm1 = vcmp.eq.s32.totalorder %v60_v9, %v67_v10  ;;  %vm78_vm2 = vcmp.eq.s32.totalorder %v60_v9, %v77_v11 }
  0x9d   :  { %vm69_vm4 = vmor %vm64_vm0, %vm68_vm1 }
  0x9e   :  { %vm74_vm6 = vmor %vm69_vm4, %vm73_vm3 }
  0x9f   :  { %vm79_vm7 = vmor %vm74_vm6, %vm78_vm2 }
  0xa0   :  { %v81_v13 = vsel %vm79_vm7, %v57_v12, 0.0 }
  0xa1   :  { %v83_v14 = vsel %vm82_vm5, %v81_v13, 0.0 }
  0xa2   :  { %v84_v15 = vrot.slane %v83_v14, 4 }
  0xa4   :  { %v85_v16 = vadd.f32 %v84_v15, %v83_v14 }
  0xa6   :  { %v86_v17 = vrot.slane %v85_v16, 2 }
  0xa8   :  { %v87_v18 = vadd.f32 %v86_v17, %v85_v16 }
  0xaa   :  { %v88_v19 = vrot.slane %v87_v18, 1 }
  0xac   :  { %v89_v21 = vadd.f32 %v88_v19, %v87_v18 }
  0xae   :  { %v90_v22 = vadd.f32 %v89_v21, %v80_v20 }
  0xb0   :  { %91 = vst [vmem:[#allocation2] sm:$0x1] %v90_v22 }
  0xb7   :  { %v95_v23 = vld [vmem:[#allocation2] sm:$0x1] }
  0xb8   :  { %96 = vst [vmem:[#allocation8] sm:$0x1] %v95_v23 }
  0xb9   :  { %181 = shalt.err (!%p178_p0)
}
  0xba   :  { %106 = dma.vmem_to_hbm [thread:$0]  %s104_s1, 16, %s230_s2, [#allocation5]  }
  0xbb   :  { %194 = dma.done.wait [#allocation5], 16  }
  0xbc   :  { %195 = vsyncadd [#allocation5], 4294967280 }
  0xbd   :  { %110 = vsyncpa [#allocation4], 1 }
  0xbe   :  { %111 = vsyncpa [#allocation7], 1 }
  0xbf   :  { %112 = vsyncpa [#allocation5], 1 }

</bundles_post_ra>
